<compile_context>
chip_gen: v6e
topology: v6e:2x2x1
jax: 0.10.0
libtpu: 0.0.40
codegen_flags: <defaults>
</compile_context>

<pallas_src>
import functools

import jax
import jax.numpy as jnp
from jax.experimental import pallas as pl
from jax.experimental.pallas import tpu as pltpu


LEAKY_SLOPE = 0.01  # F.leaky_relu default negative_slope
HID = 128           # lane-padded hidden width (covers 60 and 100)


def _round_up(x, m):
    return ((x + m - 1) // m) * m


def _leaky_relu(x):
    # max(x, 0.01*x) == leaky_relu(x); one vmul + one vmax, dtype-preserving.
    return jnp.maximum(x, LEAKY_SLOPE * x)


# ---------------------------------------------------------------------------
# Kernel
# ---------------------------------------------------------------------------
def singular_net_kernel(x_ref,
                        w1_ref, b1_ref,
                        w2_ref, b2_ref,
                        w3_ref, b3_ref,
                        w4_ref, b4_ref,
                        out_ref):
    """One (TILE_B, n) batch tile through the whole (lane-padded) MLP."""
    x = x_ref[...].astype(jnp.bfloat16)                       # cast in-kernel

    # Layer 1: n -> 128 (real 60).  bf16 epilogue feeds the next bf16 matmul.
    h = jnp.dot(x, w1_ref[...], preferred_element_type=jnp.float32)
    h = _leaky_relu(h.astype(jnp.bfloat16) + b1_ref[...])     # (TB, 128) bf16

    # Layer 2: 128 -> 128 (real 60 -> 100).
    h = jnp.dot(h, w2_ref[...], preferred_element_type=jnp.float32)
    h = _leaky_relu(h.astype(jnp.bfloat16) + b2_ref[...])     # (TB, 128) bf16

    # Layer 3: 128 -> 128 (real 100 -> 100).  f32 epilogue: its consumer is
    # the f32 VPU reduce below, no further MXU matmul.
    h = jnp.dot(h, w3_ref[...], preferred_element_type=jnp.float32)
    h = _leaky_relu(h + b3_ref[...])                          # (TB, 128) f32

    # Layer 4: 128 -> 1 as VPU multiply + XLU lane reduction against the one
    # real w4 column (padded cols of h and w4 are exactly zero -> exact).
    y = jnp.sum(h * w4_ref[...], axis=-1, keepdims=True)      # (TB, 1) f32
    out_ref[...] = y + b4_ref[...]                            # (TB, 8) f32


# ---------------------------------------------------------------------------
# Parameter prep (pad hidden widths to 128 lanes; zero padding is exact)
# ---------------------------------------------------------------------------
def prepare_params(params, n):
    """Input params (unpadded, f32): w1..w4 as (in, out) [PyTorch weight.T],
    b1..b4 as (1, out).

    Returns kernel operands:
      w1 (n,128) bf16, w2/w3 (128,128) bf16, b1/b2 (1,128) bf16,
      b3 (1,128) f32, w4 (1,128) f32 (single real output column as a row),
      b4 (1,8) f32 (scalar replicated across the 8 output lanes).
    """
    w1 = jnp.zeros((n, HID), jnp.float32).at[:, :60].set(params["w1"])
    b1 = jnp.zeros((1, HID), jnp.float32).at[:, :60].set(params["b1"])
    w2 = jnp.zeros((HID, HID), jnp.float32).at[:60, :100].set(params["w2"])
    b2 = jnp.zeros((1, HID), jnp.float32).at[:, :100].set(params["b2"])
    w3 = jnp.zeros((HID, HID), jnp.float32).at[:100, :100].set(params["w3"])
    b3 = jnp.zeros((1, HID), jnp.float32).at[:, :100].set(params["b3"])
    w4 = jnp.zeros((1, HID), jnp.float32).at[0, :100].set(params["w4"][:, 0])
    b4 = jnp.broadcast_to(params["b4"], (1, 8)).astype(jnp.float32)
    return {
        "w1": w1.astype(jnp.bfloat16),
        "b1": b1.astype(jnp.bfloat16),
        "w2": w2.astype(jnp.bfloat16),
        "b2": b2.astype(jnp.bfloat16),
        "w3": w3.astype(jnp.bfloat16),
        "b3": b3,            # f32 (f32 epilogue for layer 3)
        "w4": w4,            # f32 row for the VPU reduce
        "b4": b4,            # f32
    }


# ---------------------------------------------------------------------------
# Wrapper
# ---------------------------------------------------------------------------
@functools.partial(jax.jit, static_argnames=("tile_b",))
def singular_net_forward(x, params, *, tile_b=2048):
    """x: (B, n) f32.  params: unpadded f32 dict (w as (in,out), b as (1,out)).

    Returns (B, 1) f32, matching PyTorch SingularNet.forward (bf16 matmul
    operands with f32 accumulation -> O(1e-2) relative diff vs fp32-exact).
    """
    B, n = x.shape

    # Batch tile: big (amortize per-grid-step overhead), capped at ceil(B/2)
    # rounded to the 8-row sublane so the parallel axis keeps >= 2 grid steps
    # (v7x dual-TensorCore sharding); minimum 8.
    B8 = _round_up(B, 8)
    cap = _round_up(pl.cdiv(B8, 2), 8) if B8 >= 16 else B8
    TILE_B = max(8, min(tile_b, cap))
    B_pad = _round_up(B, TILE_B)
    grid = (B_pad // TILE_B,)

    if B_pad != B:
        x = jnp.pad(x, ((0, B_pad - B), (0, 0)))   # only when TILE_B doesn't divide B

    p = prepare_params(params, n)

    const2 = lambda i: (0, 0)   # weights/biases: resident, fetched once
    in_specs = [
        pl.BlockSpec((TILE_B, n), lambda i: (i, 0)),   # x (streamed, raw f32)
        pl.BlockSpec((n, HID), const2),                # w1
        pl.BlockSpec((1, HID), const2),                # b1
        pl.BlockSpec((HID, HID), const2),              # w2
        pl.BlockSpec((1, HID), const2),                # b2
        pl.BlockSpec((HID, HID), const2),              # w3
        pl.BlockSpec((1, HID), const2),                # b3
        pl.BlockSpec((1, HID), const2),                # w4 row
        pl.BlockSpec((1, 8), const2),                  # b4
    ]

    flops = 2 * B_pad * (n * HID + 2 * HID * HID + HID)
    bytes_accessed = (B_pad * n * 4
                      + sum(int(v.size) * v.dtype.itemsize for v in p.values())
                      + B_pad * 8 * 4)

    out_padded = pl.pallas_call(
        singular_net_kernel,
        out_shape=jax.ShapeDtypeStruct((B_pad, 8), jnp.float32),
        grid=grid,
        in_specs=in_specs,
        out_specs=pl.BlockSpec((TILE_B, 8), lambda i: (i, 0)),
        compiler_params=pltpu.CompilerParams(
            dimension_semantics=("parallel",),
            vmem_limit_bytes=32 * 1024 * 1024,   # safe under v7x's 64 MiB VMEM
        ),
        cost_estimate=pl.CostEstimate(
            flops=flops, transcendentals=0, bytes_accessed=bytes_accessed),
    )(x, p["w1"], p["b1"], p["w2"], p["b2"], p["w3"], p["b3"], p["w4"], p["b4"])

    # Narrow slab -> real (B, 1) output; slicing is cheap in XLA.
    return out_padded[:B, :1]


# ---------------------------------------------------------------------------
# Init + pure-JAX reference (mirrors kernel dtype handling)
# ---------------------------------------------------------------------------
def init_params(key, n):
    """nn.Linear-style U(-1/sqrt(fan_in), 1/sqrt(fan_in)) init.
    Weights in (in, out) layout (i.e. PyTorch weight.T)."""
    dims = [(n, 60), (60, 100), (100, 100), (100, 1)]
    params = {}
    keys = jax.random.split(key, 2 * len(dims))
    for i, (fan_in, fan_out) in enumerate(dims):
        bound = 1.0 / jnp.sqrt(jnp.float32(fan_in))
        params[f"w{i + 1}"] = jax.random.uniform(
            keys[2 * i], (fan_in, fan_out), minval=-bound, maxval=bound,
            dtype=jnp.float32)
        params[f"b{i + 1}"] = jax.random.uniform(
            keys[2 * i + 1], (1, fan_out), minval=-bound, maxval=bound,
            dtype=jnp.float32)
    return params


def reference_forward(x, p):
    """Pure-JAX reference mirroring the kernel's dtype choices."""
    def bdot(a_bf16, w):
        return jnp.dot(a_bf16, w.astype(jnp.bfloat16),
                       preferred_element_type=jnp.float32)
    h = bdot(x.astype(jnp.bfloat16), p["w1"])
    h = _leaky_relu(h.astype(jnp.bfloat16) + p["b1"].astype(jnp.bfloat16))
    h = bdot(h, p["w2"])
    h = _leaky_relu(h.astype(jnp.bfloat16) + p["b2"].astype(jnp.bfloat16))
    h = bdot(h, p["w3"])
    h = _leaky_relu(h + p["b3"])                              # f32 epilogue
    return jnp.sum(h * p["w4"][:, 0][None, :], axis=-1, keepdims=True) + p["b4"]


if __name__ == "__main__":
    key = jax.random.PRNGKey(0)
    k_param, k_x = jax.random.split(key)

    n = 32   # input feature dim (the `n` argument of SingularNet)
    B = 8    # batch size

    params = init_params(k_param, n)
    x = jax.random.normal(k_x, (B, n), dtype=jnp.float32)

    out = singular_net_forward(x, params)
    out = jax.block_until_ready(out)

    ref = reference_forward(x, params)
    assert out.shape == (B, 1)
    assert jnp.allclose(out, ref, atol=1e-2, rtol=1e-2), "mismatch vs JAX reference"

    print("KERNEL_OK")
</pallas_src>

<mosaic_0001>
module attributes {stable_mosaic.version = 11 : i64} {
  func.func @singular_net_kernel(%arg0: i32, %arg1: memref<8x32xf32, #tpu.memory_space<vmem>>, %arg2: memref<32x128xbf16, #tpu.memory_space<vmem>>, %arg3: memref<1x128xbf16, #tpu.memory_space<vmem>>, %arg4: memref<128x128xbf16, #tpu.memory_space<vmem>>, %arg5: memref<1x128xbf16, #tpu.memory_space<vmem>>, %arg6: memref<128x128xbf16, #tpu.memory_space<vmem>>, %arg7: memref<1x128xf32, #tpu.memory_space<vmem>>, %arg8: memref<1x128xf32, #tpu.memory_space<vmem>>, %arg9: memref<1x8xf32, #tpu.memory_space<vmem>>, %arg10: memref<8x8xf32, #tpu.memory_space<vmem>>) attributes {dimension_semantics = [#tpu.dimension_semantics<parallel>], iteration_bounds = array<i64: 1>, scalar_prefetch = 0 : i64, scratch_operands = 0 : i64, tpu.core_type = #tpu.core_type<tc>, window_params = [{transform_indices = @transform_0, window_bounds = array<i64: 8, 32>}, {pipeline_mode = #tpu.pipeline_mode<synchronous>, transform_indices = @transform_1, window_bounds = array<i64: 32, 128>}, {pipeline_mode = #tpu.pipeline_mode<synchronous>, transform_indices = @transform_2, window_bounds = array<i64: 1, 128>}, {pipeline_mode = #tpu.pipeline_mode<synchronous>, transform_indices = @transform_3, window_bounds = array<i64: 128, 128>}, {pipeline_mode = #tpu.pipeline_mode<synchronous>, transform_indices = @transform_4, window_bounds = array<i64: 1, 128>}, {pipeline_mode = #tpu.pipeline_mode<synchronous>, transform_indices = @transform_5, window_bounds = array<i64: 128, 128>}, {pipeline_mode = #tpu.pipeline_mode<synchronous>, transform_indices = @transform_6, window_bounds = array<i64: 1, 128>}, {pipeline_mode = #tpu.pipeline_mode<synchronous>, transform_indices = @transform_7, window_bounds = array<i64: 1, 128>}, {pipeline_mode = #tpu.pipeline_mode<synchronous>, transform_indices = @transform_8, window_bounds = array<i64: 1, 8>}, {transform_indices = @transform_9, window_bounds = array<i64: 8, 8>}]} {
    %c0 = arith.constant 0 : index
    %c0_0 = arith.constant 0 : index
    %0 = vector.load %arg1[%c0, %c0_0] : memref<8x32xf32, #tpu.memory_space<vmem>>, vector<8x32xf32>
    %1 = arith.truncf %0 : vector<8x32xf32> to vector<8x32xbf16>
    %c0_1 = arith.constant 0 : index
    %c0_2 = arith.constant 0 : index
    %2 = vector.load %arg2[%c0_1, %c0_2] : memref<32x128xbf16, #tpu.memory_space<vmem>>, vector<32x128xbf16>
    %cst = arith.constant dense<0.000000e+00> : vector<8x128xf32>
    %3 = tpu.matmul %1, %2, %cst {dimension_numbers = #tpu.dot_dimension_numbers<[1], [0], [0], [1], [0, 0, 1, 1], [], []>} : vector<8x32xbf16>, vector<32x128xbf16>, vector<8x128xf32> -> vector<8x128xf32>
    %4 = arith.truncf %3 : vector<8x128xf32> to vector<8x128xbf16>
    %c0_3 = arith.constant 0 : index
    %c0_4 = arith.constant 0 : index
    %5 = vector.load %arg3[%c0_3, %c0_4] : memref<1x128xbf16, #tpu.memory_space<vmem>>, vector<1x128xbf16>
    %6 = vector.broadcast %5 : vector<1x128xbf16> to vector<8x128xbf16>
    %7 = arith.addf %4, %6 : vector<8x128xbf16>
    %cst_5 = arith.constant 1.000980e-02 : bf16
    %8 = vector.broadcast %cst_5 : bf16 to vector<8x128xbf16>
    %9 = arith.mulf %8, %7 : vector<8x128xbf16>
    %10 = arith.maximumf %7, %9 : vector<8x128xbf16>
    %c0_6 = arith.constant 0 : index
    %c0_7 = arith.constant 0 : index
    %11 = vector.load %arg4[%c0_6, %c0_7] : memref<128x128xbf16, #tpu.memory_space<vmem>>, vector<128x128xbf16>
    %cst_8 = arith.constant dense<0.000000e+00> : vector<8x128xf32>
    %12 = tpu.matmul %10, %11, %cst_8 {dimension_numbers = #tpu.dot_dimension_numbers<[1], [0], [0], [1], [0, 0, 1, 1], [], []>} : vector<8x128xbf16>, vector<128x128xbf16>, vector<8x128xf32> -> vector<8x128xf32>
    %13 = arith.truncf %12 : vector<8x128xf32> to vector<8x128xbf16>
    %c0_9 = arith.constant 0 : index
    %c0_10 = arith.constant 0 : index
    %14 = vector.load %arg5[%c0_9, %c0_10] : memref<1x128xbf16, #tpu.memory_space<vmem>>, vector<1x128xbf16>
    %15 = vector.broadcast %14 : vector<1x128xbf16> to vector<8x128xbf16>
    %16 = arith.addf %13, %15 : vector<8x128xbf16>
    %cst_11 = arith.constant 1.000980e-02 : bf16
    %17 = vector.broadcast %cst_11 : bf16 to vector<8x128xbf16>
    %18 = arith.mulf %17, %16 : vector<8x128xbf16>
    %19 = arith.maximumf %16, %18 : vector<8x128xbf16>
    %c0_12 = arith.constant 0 : index
    %c0_13 = arith.constant 0 : index
    %20 = vector.load %arg6[%c0_12, %c0_13] : memref<128x128xbf16, #tpu.memory_space<vmem>>, vector<128x128xbf16>
    %cst_14 = arith.constant dense<0.000000e+00> : vector<8x128xf32>
    %21 = tpu.matmul %19, %20, %cst_14 {dimension_numbers = #tpu.dot_dimension_numbers<[1], [0], [0], [1], [0, 0, 1, 1], [], []>} : vector<8x128xbf16>, vector<128x128xbf16>, vector<8x128xf32> -> vector<8x128xf32>
    %c0_15 = arith.constant 0 : index
    %c0_16 = arith.constant 0 : index
    %22 = vector.load %arg7[%c0_15, %c0_16] : memref<1x128xf32, #tpu.memory_space<vmem>>, vector<1x128xf32>
    %23 = vector.broadcast %22 : vector<1x128xf32> to vector<8x128xf32>
    %24 = arith.addf %21, %23 : vector<8x128xf32>
    %cst_17 = arith.constant 0.00999999977 : f32
    %25 = vector.broadcast %cst_17 : f32 to vector<8x128xf32>
    %26 = arith.mulf %25, %24 : vector<8x128xf32>
    %27 = arith.maximumf %24, %26 : vector<8x128xf32>
    %c0_18 = arith.constant 0 : index
    %c0_19 = arith.constant 0 : index
    %28 = vector.load %arg8[%c0_18, %c0_19] : memref<1x128xf32, #tpu.memory_space<vmem>>, vector<1x128xf32>
    %29 = vector.broadcast %28 : vector<1x128xf32> to vector<8x128xf32>
    %30 = arith.mulf %27, %29 : vector<8x128xf32>
    %cst_20 = arith.constant dense<0.000000e+00> : vector<8xf32>
    %31 = vector.multi_reduction <add>, %30, %cst_20 [1] : vector<8x128xf32> to vector<8xf32>
    %32 = vector.shape_cast %31 : vector<8xf32> to vector<8x1xf32>
    %c0_21 = arith.constant 0 : index
    %c0_22 = arith.constant 0 : index
    %33 = vector.load %arg9[%c0_21, %c0_22] : memref<1x8xf32, #tpu.memory_space<vmem>>, vector<1x8xf32>
    %34 = vector.broadcast %32 : vector<8x1xf32> to vector<8x8xf32>
    %35 = vector.broadcast %33 : vector<1x8xf32> to vector<8x8xf32>
    %36 = arith.addf %34, %35 : vector<8x8xf32>
    %c0_23 = arith.constant 0 : index
    %c0_24 = arith.constant 0 : index
    %37 = vector.load %arg10[%c0_23, %c0_24] : memref<8x8xf32, #tpu.memory_space<vmem>>, vector<8x8xf32>
    tpu.vector_store %arg10[%c0_23, %c0_24], %36 {strides = array<i32>} : memref<8x8xf32, #tpu.memory_space<vmem>>, vector<8x8xf32>,
    return
  }
  func.func @transform_0(%arg0: i32) -> (i32, i32) {
    %c0_i32 = arith.constant 0 : i32
    %c0_i32_0 = arith.constant 0 : i32
    return %arg0, %c0_i32 : i32, i32
  }
  func.func @transform_1(%arg0: i32) -> (i32, i32) {
    %c0_i32 = arith.constant 0 : i32
    %c0_i32_0 = arith.constant 0 : i32
    %c0_i32_1 = arith.constant 0 : i32
    return %c0_i32, %c0_i32_0 : i32, i32
  }
  func.func @transform_2(%arg0: i32) -> (i32, i32) {
    %c0_i32 = arith.constant 0 : i32
    %c0_i32_0 = arith.constant 0 : i32
    %c0_i32_1 = arith.constant 0 : i32
    return %c0_i32, %c0_i32_0 : i32, i32
  }
  func.func @transform_3(%arg0: i32) -> (i32, i32) {
    %c0_i32 = arith.constant 0 : i32
    %c0_i32_0 = arith.constant 0 : i32
    %c0_i32_1 = arith.constant 0 : i32
    return %c0_i32, %c0_i32_0 : i32, i32
  }
  func.func @transform_4(%arg0: i32) -> (i32, i32) {
    %c0_i32 = arith.constant 0 : i32
    %c0_i32_0 = arith.constant 0 : i32
    %c0_i32_1 = arith.constant 0 : i32
    return %c0_i32, %c0_i32_0 : i32, i32
  }
  func.func @transform_5(%arg0: i32) -> (i32, i32) {
    %c0_i32 = arith.constant 0 : i32
    %c0_i32_0 = arith.constant 0 : i32
    %c0_i32_1 = arith.constant 0 : i32
    return %c0_i32, %c0_i32_0 : i32, i32
  }
  func.func @transform_6(%arg0: i32) -> (i32, i32) {
    %c0_i32 = arith.constant 0 : i32
    %c0_i32_0 = arith.constant 0 : i32
    %c0_i32_1 = arith.constant 0 : i32
    return %c0_i32, %c0_i32_0 : i32, i32
  }
  func.func @transform_7(%arg0: i32) -> (i32, i32) {
    %c0_i32 = arith.constant 0 : i32
    %c0_i32_0 = arith.constant 0 : i32
    %c0_i32_1 = arith.constant 0 : i32
    return %c0_i32, %c0_i32_0 : i32, i32
  }
  func.func @transform_8(%arg0: i32) -> (i32, i32) {
    %c0_i32 = arith.constant 0 : i32
    %c0_i32_0 = arith.constant 0 : i32
    %c0_i32_1 = arith.constant 0 : i32
    return %c0_i32, %c0_i32_0 : i32, i32
  }
  func.func @transform_9(%arg0: i32) -> (i32, i32) {
    %c0_i32 = arith.constant 0 : i32
    %c0_i32_0 = arith.constant 0 : i32
    return %arg0, %c0_i32 : i32, i32
  }
}

</mosaic_0001>

<bundles_post_ra>
// kernel: singular_net_forward.1
= control target key start
LH: loop header
LB: loop body
LE: loop exit
PB: predicated region body
PF: predicated region fallthrough
CT: control target
= control target key end

     0   :  { %v472_v0 = vmov 0.0   ;;  %vm473_vm0 = vmmov 0   ;;  %vm52_vm1 = vcmask 261120   ;;  %v101_v19 = vlaneseq  ;;  %s623_s1 = inlined_call_operand.vmem [shape: bf16[32,128], index: 1, kind: input, shape index: {}]   ;;  %s624_s0 = inlined_call_operand.vmem [shape: f32[8,32], index: 0, kind: input, shape index: {}]   ;;  %s625_s3 = inlined_call_operand.vmem [shape: bf16[128,128], index: 3, kind: input, shape index: {}]   ;;  %s626_s5 = inlined_call_operand.vmem [shape: bf16[128,128], index: 5, kind: input, shape index: {}]   ;;  %s627_s2 = inlined_call_operand.vmem [shape: bf16[1,128], index: 2, kind: input, shape index: {}]   ;;  %s628_s4 = inlined_call_operand.vmem [shape: bf16[1,128], index: 4, kind: input, shape index: {}]   ;;  %s629_s6 = inlined_call_operand.vmem [shape: f32[1,128], index: 6, kind: input, shape index: {}]   ;;  %s630_s7 = inlined_call_operand.vmem [shape: f32[1,128], index: 7, kind: input, shape index: {}]   ;;  %s631_s8 = inlined_call_operand.vmem [shape: f32[1,8], index: 8, kind: input, shape index: {}]   ;;  %s632_s9 = inlined_call_operand.vmem [shape: f32[8,8], index: 9, kind: output, shape index: {}]  }
   0x1   :  { %404 = vmatprep.subr.bf16.mxu0 %v472_v0  ;;  %v454_v1 = vld [vmem:[%s623_s1 + $0x8] sm:$0xff]   ;;  %408 = vmatprep.mubr.msk.bf16.mxu0 %vm473_vm0, %v472_v0  ;;  %v455_v2 = vld [vmem:[%s623_s1] sm:$0xff]   ;;  %v456_v4 = vld [vmem:[%s625_s3 + $0x38] sm:$0xff]   ;;  %vm355_vm2 = vcmask 64512  }
   0x2   :  { %412 = vmatprep.subr.bf16.mxu1 %v472_v0  ;;  %428 = vmatprep.mubr.msk.bf16.mxu1 %vm473_vm0, %v472_v0  ;;  %v34_v3 = vld [vmem:[%s624_s0] sm:$0xff]  ;;  %v457_v6 = vld [vmem:[%s625_s3 + $0x30] sm:$0xff]   ;;  %v458_v7 = vld [vmem:[%s625_s3 + $0x28] sm:$0xff]   ;;  %v102_v20 = vshrl.u32 %v101_v19, 7 }
   0x3   :  { %405 = vmatpush3.bf16.msra.mxu0 %v454_v1  ;;  %v35_v5 = vpack.c.bf16 %v34_v3, %v34_v3  ;;  %413 = vmatpush3.bf16.msra.mxu1 %v456_v4  ;;  %v459_v8 = vld [vmem:[%s625_s3 + $0x20] sm:$0xff]   ;;  %v460_v9 = vld [vmem:[%s625_s3 + $0x18] sm:$0xff]   ;;  %v461_v10 = vld [vmem:[%s625_s3 + $0x10] sm:$0xff]  }
   0x4   :  { %406 = vmatprep.subr.bf16.mxu0 %v472_v0  ;;  %414 = vmatprep.subr.bf16.mxu1 %v472_v0  ;;  %v462_v11 = vld [vmem:[%s625_s3 + $0x8] sm:$0xff]   ;;  %v463_v12 = vld [vmem:[%s625_s3] sm:$0xff]   ;;  %v464_v13 = vld [vmem:[%s626_s5 + $0x38] sm:$0xff]   ;;  %v103_v23 = vsub.s32 0, %v102_v20 }
   0x5   :  { %v465_v14 = vld [vmem:[%s626_s5 + $0x30] sm:$0xff]   ;;  %v466_v15 = vld [vmem:[%s626_s5 + $0x28] sm:$0xff]   ;;  %v467_v16 = vld [vmem:[%s626_s5 + $0x20] sm:$0xff]  }
   0x6   :  { %v468_v17 = vld [vmem:[%s626_s5 + $0x18] sm:$0xff]   ;;  %v469_v18 = vld [vmem:[%s626_s5 + $0x10] sm:$0xff]   ;;  %v97_v21 = vld [vmem:[%s627_s2] sm:$0x1] }
   0x7   :  { %407 = vmatpush3.bf16.msra.mxu0 %v455_v2  ;;  %415 = vmatpush3.bf16.msra.mxu1 %v457_v6  ;;  %v99_v22 = vpack.i.b16 %v97_v21, %v97_v21  ;;  %v470_v33 = vld [vmem:[%s626_s5 + $0x8] sm:$0xff]   ;;  %v471_v34 = vld [vmem:[%s626_s5] sm:$0xff]  }
   0x8   :  { %432 = vmatprep.subr.bf16.mxu0 %v472_v0  ;;  %416 = vmatprep.subr.bf16.mxu1 %v472_v0  ;;  %v213_v35 = vld [vmem:[%s628_s4] sm:$0x1] }
   0x9   :  { %v104_v24 = vrot.slane %v99_v22, %v103_v23  ;;  %v215_v36 = vpack.i.b16 %v213_v35, %v213_v35  ;;  %v372_v46 = vld [vmem:[%s629_s6] ss:$0 sm:$0xff] }
   0xa   :  { %409 = vmatmul.mubr.msk.bf16.vlgmr.msra.gmra.mxu0 %vm52_vm1, %v35_v5  ;;  %v381_v52 = vld [vmem:[%s630_s7] ss:$0 sm:$0xff] }
   0xb   :  { %448 = vmatprep.mubr.msk.bf16.mxu0 %vm473_vm0, %v472_v0  ;;  %417 = vmatpush3.bf16.msra.mxu1 %v458_v7  ;;  %v220_v37 = vrot.slane %v215_v36, %v103_v23  ;;  %v382_v56 = vld [vmem:[%s631_s8] ss:$0 sm:$0xff] }
   0xc   :  { %418 = vmatprep.subr.bf16.mxu1 %v472_v0  ;;  %433 = vmatpush3.bf16.msra.mxu0 %v464_v13 }
   0xd   :  { %434 = vmatprep.subr.bf16.mxu0 %v472_v0 }
   0xf   :  { %419 = vmatpush3.bf16.msra.mxu1 %v459_v8 }
  0x10   :  { %420 = vmatprep.subr.bf16.mxu1 %v472_v0  ;;  %435 = vmatpush3.bf16.msra.mxu0 %v465_v14 }
  0x11   :  { %436 = vmatprep.subr.bf16.mxu0 %v472_v0 }
  0x13   :  { %421 = vmatpush3.bf16.msra.mxu1 %v460_v9 }
  0x14   :  { %422 = vmatprep.subr.bf16.mxu1 %v472_v0  ;;  %437 = vmatpush3.bf16.msra.mxu0 %v466_v15 }
  0x15   :  { %438 = vmatprep.subr.bf16.mxu0 %v472_v0 }
  0x17   :  { %423 = vmatpush3.bf16.msra.mxu1 %v461_v10 }
  0x18   :  { %424 = vmatprep.subr.bf16.mxu1 %v472_v0  ;;  %439 = vmatpush3.bf16.msra.mxu0 %v467_v16 }
  0x19   :  { %440 = vmatprep.subr.bf16.mxu0 %v472_v0 }
  0x1b   :  { %425 = vmatpush3.bf16.msra.mxu1 %v462_v11 }
  0x1c   :  { %426 = vmatprep.subr.bf16.mxu1 %v472_v0  ;;  %441 = vmatpush3.bf16.msra.mxu0 %v468_v17 }
  0x1d   :  { %442 = vmatprep.subr.bf16.mxu0 %v472_v0 }
  0x1f   :  { %427 = vmatpush3.bf16.msra.mxu1 %v463_v12 }
  0x20   :  { %443 = vmatpush3.bf16.msra.mxu0 %v469_v18 }
  0x21   :  { %444 = vmatprep.subr.bf16.mxu0 %v472_v0 }
  0x24   :  { %445 = vmatpush3.bf16.msra.mxu0 %v470_v33 }
  0x25   :  { %446 = vmatprep.subr.bf16.mxu0 %v472_v0 }
  0x28   :  { %447 = vmatpush3.bf16.msra.mxu0 %v471_v34 }
  0xca   :  { %v90_v25 = vpop.f32.mrf.mxu0 }
  0xcb   :  { %v96_v26 = vpack.c.bf16 %v90_v25, %v90_v25 }
  0xcc   :  { %v410_v27 = vpop.f32.mrf.mxu0 }
  0xcd   :  { %v105_v28 = vadd.bf16 %v104_v24, %v96_v26 }
  0xce   :  { %v93_v29 = vpop.f32.mrf.mxu0 }
  0xcf   :  { %v106_v30 = vmul.bf16 1009007652, %v105_v28 }
  0xd0   :  { %v411_v31 = vpop.f32.mrf.mxu0 }
  0xd1   :  { %v107_v32 = vmax.bf16 %v106_v30, %v105_v28 }
  0xd3   :  { %429 = vmatmul.mubr.bf16.vlgmr.msra.gmra.mxu1 %v107_v32 }
 0x193   :  { %v206_v38 = vpop.f32.mrf.mxu1 }
 0x194   :  { %v212_v39 = vpack.c.bf16 %v206_v38, %v206_v38 }
 0x195   :  { %v430_v40 = vpop.f32.mrf.mxu1 }
 0x196   :  { %v221_v41 = vadd.bf16 %v220_v37, %v212_v39 }
 0x197   :  { %v209_v42 = vpop.f32.mrf.mxu1 }
 0x198   :  { %v222_v43 = vmul.bf16 1009007652, %v221_v41 }
 0x199   :  { %v431_v44 = vpop.f32.mrf.mxu1 }
 0x19a   :  { %v223_v45 = vmax.bf16 %v222_v43, %v221_v41 }
 0x19c   :  { %449 = vmatmul.mubr.bf16.vlgmr.msra.gmra.mxu0 %v223_v45 }
 0x25c   :  { %v329_v47 = vpop.f32.mrf.mxu0 }
 0x25d   :  { %v330_v48 = vadd.f32 %v372_v46, %v329_v47 }
 0x25e   :  { %v450_v49 = vpop.f32.mrf.mxu0 }
 0x25f   :  { %v335_v50 = vmul.f32 0.01, %v330_v48 }
 0x260   :  { %v332_v51 = vpop.f32.mrf.mxu0 }
 0x261   :  { %v336_v53 = vmax.f32 %v330_v48, %v335_v50 }
 0x262   :  { %v451_v54 = vpop.f32.mrf.mxu0 }
 0x263   :  { %v344_v55 = vmul.f32 %v381_v52, %v336_v53 }
 0x265   :  { %345 = vadd.xlane.f32.xlu0 %v344_v55 }
 0x2ee   :  { %v346_v57 = vpop.xlane.xlu0 %345 }
 0x2ef   :  { %v354_v58 = vadd.f32 %v382_v56, %v346_v57 }
 0x2f1   :  { %356 = vst.msk [vmem:[%s632_s9] sm:$0xff] %vm355_vm2, %v354_v58 }

</bundles_post_ra>
